<compile_context>
chip_gen: v7x
topology: tpu7x:2x2x1
jax: 0.10.0
libtpu: 0.0.40
codegen_flags: <defaults>
</compile_context>

<pallas_src>
import functools

import jax
import jax.numpy as jnp
import numpy as np
from jax.experimental import pallas as pl
from jax.experimental.pallas import tpu as pltpu


# Sublane alignment that is layout-safe for f32 (8), bf16 (16) and int8 (32) tiles.
_SUBLANE = 32
_NUM_PARTIALS = 8
_OUT_LANES = 128  # lane-dense output block (partial sums in lanes 0..7, zero pad after)


def _partials_kernel(thr_ref, scores_ref, gt_ref, out_ref, *, total_rows, masked):
    # thr_ref:    SMEM (1,) f32 threshold
    # scores_ref: VMEM (block_b, K), native dtype (upcast to f32 for the compare)
    # gt_ref:     VMEM (block_b, K), native dtype (int8 recommended), values in {0, 1}
    # out_ref:    VMEM (1, 1, 128) f32 per-block partial sums (lanes 0..7 used)
    scores = scores_ref[...].astype(jnp.float32)   # compare in f32 (bf16/fp8-safe)
    blk, K = scores.shape                            # static
    thr = thr_ref[0]

    # binary_predictions = (scores >= threshold)
    pred = (scores >= thr).astype(jnp.float32)
    gt = gt_ref[...].astype(jnp.float32)
    tp = pred * gt  # == corrects*pred == corrects*gt for binary pred/gt

    pred_sum = jnp.sum(pred, axis=1, keepdims=True)  # (blk, 1)
    gt_sum = jnp.sum(gt, axis=1, keepdims=True)
    tp_sum = jnp.sum(tp, axis=1, keepdims=True)
    # sum(corrects) per row, without ever materializing `corrects`
    corrects_sum = np.float32(K) - pred_sum - gt_sum + 2.0 * tp_sum

    acc_row = corrects_sum * np.float32(1.0 / K)
    # Exact divides (not pl.reciprocal(approx=True)) to stay bit-close to the PyTorch
    # reference; zero denominators produce NaN exactly like torch.
    prec_row = tp_sum / pred_sum
    rec_row = tp_sum / gt_sum
    f1_row = 2.0 * prec_row * rec_row / (prec_row + rec_row)

    if masked:
        # cdiv-grid tail block: rows >= total_rows are padding and must contribute 0.
        row_idx = (pl.program_id(0) * blk
                   + jax.lax.broadcasted_iota(jnp.int32, (blk, 1), 0))
        valid = row_idx < total_rows

        def colsum(x):  # (blk, 1) -> (1, 1), NaN/garbage-safe for padded rows
            return jnp.sum(jnp.where(valid, x, jnp.float32(0.0)), axis=0, keepdims=True)
    else:
        def colsum(x):  # (blk, 1) -> (1, 1)
            return jnp.sum(x, axis=0, keepdims=True)

    pad = jnp.zeros((1, _OUT_LANES - _NUM_PARTIALS), jnp.float32)
    out_ref[0] = jnp.concatenate(
        [colsum(acc_row), colsum(prec_row), colsum(rec_row), colsum(f1_row),
         colsum(corrects_sum), colsum(pred_sum), colsum(gt_sum), colsum(tp_sum), pad],
        axis=1)


def _round_up(x, m):
    return ((x + m - 1) // m) * m


def _vmem_budgets():
    """(combined per-step input-tile budget, vmem_limit_bytes), generation-aware."""
    try:
        vmem_phys = pltpu.get_tpu_info().vmem_capacity_bytes
    except Exception:
        vmem_phys = 64 * 1024 * 1024  # assume the smallest (v7x-like) VMEM
    if vmem_phys >= 128 * 1024 * 1024:
        # v5e / v6e: 128 MiB physical VMEM, scoped default is only 16/32 MiB.
        return 8 * 1024 * 1024, 64 * 1024 * 1024
    # v7x: 64 MiB physical per TensorCore -> stay well under it.
    return 4 * 1024 * 1024, 48 * 1024 * 1024


def _pick_block_b(b, row_bytes, tile_budget_bytes):
    """Rows per grid step.
      * multiple of 32 (sublane-packing-safe for f32/bf16/int8) unless the whole
        batch fits in one tiny block (block == full dim satisfies the tiling rule);
      * one combined (scores + gt) input tile stays under tile_budget_bytes;
      * >= 2 blocks whenever b > 32 so the "parallel" grid axis can feed both
        v7x TensorCores.  The grid uses cdiv + a masked tail, so block_b need not
        divide b.
    """
    budget_rows = max(_SUBLANE,
                      (tile_budget_bytes // max(1, row_bytes)) // _SUBLANE * _SUBLANE)
    if b <= _SUBLANE:
        return b
    half = _round_up((b + 1) // 2, _SUBLANE)   # guarantees >= 2 blocks for b > 32
    return min(budget_rows, half)


@functools.partial(jax.jit, static_argnames=("block_b",))
def _thresholded_metrics(scores, gt_binary, threshold, block_b=None):
    b, K = scores.shape
    tile_budget_bytes, vmem_limit_bytes = _vmem_budgets()
    if block_b is None:
        row_bytes = K * (scores.dtype.itemsize + gt_binary.dtype.itemsize)
        block_b = _pick_block_b(b, row_bytes, tile_budget_bytes)
    assert block_b == b or block_b % 8 == 0, "block_b must be a multiple of 8 or == b"
    num_blocks = pl.cdiv(b, block_b)
    has_tail = (num_blocks * block_b) != b

    thr_arr = jnp.asarray(threshold, jnp.float32).reshape((1,))
    kernel = functools.partial(_partials_kernel, total_rows=b, masked=has_tail)

    partials = pl.pallas_call(
        kernel,
        out_shape=jax.ShapeDtypeStruct((num_blocks, 1, _OUT_LANES), jnp.float32),
        grid=(num_blocks,),
        in_specs=[
            # scalar threshold: whole (1,) array resident in SMEM, untiled
            pl.BlockSpec(memory_space=pltpu.MemorySpace.SMEM),
            pl.BlockSpec((block_b, K), lambda i: (i, 0)),
            pl.BlockSpec((block_b, K), lambda i: (i, 0)),
        ],
        out_specs=pl.BlockSpec((1, 1, _OUT_LANES), lambda i: (i, 0, 0)),
        compiler_params=pltpu.CompilerParams(
            dimension_semantics=("parallel",),   # independent blocks -> megacore on v7x
            vmem_limit_bytes=vmem_limit_bytes,   # generation-aware explicit limit
        ),
    )(thr_arr, scores, gt_binary)

    # Trivial 8-scalar combine (keeps the grid axis fully parallel).
    tot = jnp.sum(partials[:, 0, :_NUM_PARTIALS], axis=0)
    inv_b = np.float32(1.0 / b)
    acc_q = tot[0] * inv_b
    prec_q = tot[1] * inv_b
    rec_q = tot[2] * inv_b
    f1_q = tot[3] * inv_b
    tot_corrects, tot_pred, tot_gt, tot_tp = tot[4], tot[5], tot[6], tot[7]
    acc_all = tot_corrects * np.float32(1.0 / (b * K))
    prec_all = tot_tp / tot_pred
    rec_all = tot_tp / tot_gt
    f1_all = 2.0 * prec_all * rec_all / (prec_all + rec_all)
    return {
        'accuracy_by_Query': acc_q,
        'precision_by_Query': prec_q,
        'recall_by_Query': rec_q,
        'f1_by_Query': f1_q,
        'accuracy_by_QueryKey': acc_all,
        'precision_by_QueryKey': prec_all,
        'recall_by_QueryKey': rec_all,
        'f1_by_QueryKey': f1_all,
    }


class ThresholdedMetrics:
    """JAX/Pallas port of the PyTorch ThresholdedMetrics module."""

    def __init__(self, num_attributes, num_attr_vals, key_support_size):
        self.num_attributes = num_attributes
        self.num_attr_vals = num_attr_vals
        self.key_support_size = key_support_size

    def make_gt(self, X_keysId):
        # one-hot via iota compare (scatter lowers poorly on TPU); int8 so the kernel
        # streams 1 B/element instead of 4 B (the kernel upcasts in VMEM).
        b = X_keysId.shape[0]
        ids = jnp.reshape(X_keysId, (b, 1)).astype(jnp.int32)
        iota = jax.lax.broadcasted_iota(jnp.int32, (b, self.key_support_size), 1)
        return (iota == ids).astype(jnp.int8)

    def __call__(self, X_queryId, scores, threshold, gt_binary, debug=False, block_b=None):
        b = X_queryId.shape[0]
        assert gt_binary.shape == (b, self.key_support_size)
        assert scores.shape == (b, self.key_support_size)
        # X_queryId is not used in the metric computation (same as PyTorch).
        # debug printing is a host-side concern and is omitted from the kernel path.
        return _thresholded_metrics(scores, gt_binary, threshold, block_b=block_b)


def _reference_metrics(scores, threshold, gt):
    """Pure-JAX reference mirroring the PyTorch code (for validation)."""
    b, K = scores.shape
    gt = gt.astype(jnp.float32)
    pred = (scores.astype(jnp.float32) >= threshold).astype(jnp.float32)
    corrects = (pred == gt).astype(jnp.float32)
    acc_row = jnp.sum(corrects, axis=1) / K
    prec_row = jnp.sum(corrects * pred, axis=1) / jnp.sum(pred, axis=1)
    rec_row = jnp.sum(corrects * gt, axis=1) / jnp.sum(gt, axis=1)
    f1_row = 2 * (prec_row * rec_row) / (prec_row + rec_row)
    acc_all = jnp.sum(corrects) / (b * K)
    prec_all = jnp.sum(corrects * pred) / jnp.sum(pred)
    rec_all = jnp.sum(corrects * gt) / jnp.sum(gt)
    f1_all = 2 * (prec_all * rec_all) / (prec_all + rec_all)
    return jnp.stack([jnp.mean(acc_row), jnp.mean(prec_row), jnp.mean(rec_row),
                      jnp.mean(f1_row), acc_all, prec_all, rec_all, f1_all])


_KEYS = ['accuracy_by_Query', 'precision_by_Query', 'recall_by_Query', 'f1_by_Query',
         'accuracy_by_QueryKey', 'precision_by_QueryKey', 'recall_by_QueryKey',
         'f1_by_QueryKey']


if __name__ == "__main__":
    # Card-game-like sizes: 4 attributes x 3 values -> 81 keys.
    num_attributes, num_attr_vals = 4, 3
    key_support_size = num_attr_vals ** num_attributes  # 81
    metric_fn = ThresholdedMetrics(num_attributes, num_attr_vals, key_support_size)
    threshold = 0.0

    # sanity-check make_gt (int8 one-hot)
    ids = jnp.arange(4, dtype=jnp.int32).reshape(4, 1) * 7
    gt_onehot = metric_fn.make_gt(ids)
    assert gt_onehot.dtype == jnp.int8
    np.testing.assert_array_equal(np.asarray(jnp.sum(gt_onehot, axis=1)), np.ones(4))

    # --- test 1: tiny single-block path (b = 8), float32 gt accepted as-is ---
    key = jax.random.PRNGKey(0)
    k1, k2, k3 = jax.random.split(key, 3)
    b = 8
    X_queryId = jax.random.randint(k1, (b, 1), 0, key_support_size)
    scores = jax.random.normal(k2, (b, key_support_size), dtype=jnp.float32)
    scores = scores.at[:, 0].set(1.0)  # guarantee >=1 positive prediction per row
    gt_binary = (jax.random.uniform(k3, (b, key_support_size)) < 0.3).astype(jnp.float32)
    gt_binary = gt_binary.at[:, 0].set(1.0)  # guarantee >=1 positive label per row

    metrics = metric_fn(X_queryId, scores, threshold, gt_binary)
    jax.block_until_ready(metrics)
    got = np.array([np.asarray(metrics[k]) for k in _KEYS])
    want = np.asarray(_reference_metrics(scores, threshold, gt_binary))
    np.testing.assert_allclose(got, want, rtol=1e-5, atol=1e-6)

    # --- test 2: b = 40, int8 gt, auto tiling -> block_b = 32, cdiv grid of 2 with a
    #             masked tail block (exercises the parallel/megacore + masking path) ---
    k4, k5, k6 = jax.random.split(jax.random.PRNGKey(1), 3)
    b2 = 40
    X_queryId2 = jax.random.randint(k4, (b2, 1), 0, key_support_size)
    scores2 = jax.random.normal(k5, (b2, key_support_size), dtype=jnp.float32)
    scores2 = scores2.at[:, 0].set(1.0)
    gt_binary2 = (jax.random.uniform(k6, (b2, key_support_size)) < 0.3).astype(jnp.int8)
    gt_binary2 = gt_binary2.at[:, 0].set(1)

    metrics2 = metric_fn(X_queryId2, scores2, threshold, gt_binary2)
    jax.block_until_ready(metrics2)
    got2 = np.array([np.asarray(metrics2[k]) for k in _KEYS])
    want2 = np.asarray(_reference_metrics(scores2, threshold, gt_binary2))
    np.testing.assert_allclose(got2, want2, rtol=1e-5, atol=1e-6)

    print("KERNEL_OK")
</pallas_src>

<mosaic_0001>
module attributes {stable_mosaic.version = 11 : i64} {
  func.func @_partials_kernel(%arg0: i32, %arg1: memref<1xf32, #tpu.memory_space<smem>>, %arg2: memref<8x81xf32, #tpu.memory_space<vmem>>, %arg3: memref<8x81xf32, #tpu.memory_space<vmem>>, %arg4: memref<1x1x128xf32, #tpu.memory_space<vmem>>) attributes {dimension_semantics = [#tpu.dimension_semantics<parallel>], iteration_bounds = array<i64: 1>, scalar_prefetch = 0 : i64, scratch_operands = 0 : i64, tpu.core_type = #tpu.core_type<tc>, window_params = [{transform_indices = @transform_0, window_bounds = array<i64: 1>}, {transform_indices = @transform_1, window_bounds = array<i64: 8, 81>}, {transform_indices = @transform_2, window_bounds = array<i64: 8, 81>}, {transform_indices = @transform_3, window_bounds = array<i64: 1, 1, 128>}]} {
    %c0 = arith.constant 0 : index
    %c0_0 = arith.constant 0 : index
    %0 = vector.load %arg2[%c0, %c0_0] : memref<8x81xf32, #tpu.memory_space<vmem>>, vector<8x81xf32>
    %c0_1 = arith.constant 0 : index
    %1 = memref.load %arg1[%c0_1] : memref<1xf32, #tpu.memory_space<smem>>
    %2 = vector.broadcast %1 : f32 to vector<8x81xf32>
    %3 = arith.cmpf oge, %0, %2 : vector<8x81xf32>
    %4 = arith.extui %3 : vector<8x81xi1> to vector<8x81xi32>
    %5 = arith.sitofp %4 : vector<8x81xi32> to vector<8x81xf32>
    %c0_2 = arith.constant 0 : index
    %c0_3 = arith.constant 0 : index
    %6 = vector.load %arg3[%c0_2, %c0_3] : memref<8x81xf32, #tpu.memory_space<vmem>>, vector<8x81xf32>
    %7 = arith.mulf %5, %6 : vector<8x81xf32>
    %cst = arith.constant dense<0.000000e+00> : vector<8xf32>
    %8 = vector.multi_reduction <add>, %5, %cst [1] : vector<8x81xf32> to vector<8xf32>
    %9 = vector.shape_cast %8 : vector<8xf32> to vector<8x1xf32>
    %cst_4 = arith.constant dense<0.000000e+00> : vector<8xf32>
    %10 = vector.multi_reduction <add>, %6, %cst_4 [1] : vector<8x81xf32> to vector<8xf32>
    %11 = vector.shape_cast %10 : vector<8xf32> to vector<8x1xf32>
    %cst_5 = arith.constant dense<0.000000e+00> : vector<8xf32>
    %12 = vector.multi_reduction <add>, %7, %cst_5 [1] : vector<8x81xf32> to vector<8xf32>
    %13 = vector.shape_cast %12 : vector<8xf32> to vector<8x1xf32>
    %cst_6 = arith.constant 8.100000e+01 : f32
    %14 = vector.broadcast %cst_6 : f32 to vector<8x1xf32>
    %15 = arith.subf %14, %9 : vector<8x1xf32>
    %16 = arith.subf %15, %11 : vector<8x1xf32>
    %cst_7 = arith.constant 2.000000e+00 : f32
    %17 = vector.broadcast %cst_7 : f32 to vector<8x1xf32>
    %18 = arith.mulf %17, %13 : vector<8x1xf32>
    %19 = arith.addf %16, %18 : vector<8x1xf32>
    %cst_8 = arith.constant 0.0123456791 : f32
    %20 = vector.broadcast %cst_8 : f32 to vector<8x1xf32>
    %21 = arith.mulf %19, %20 : vector<8x1xf32>
    %22 = arith.divf %13, %9 : vector<8x1xf32>
    %23 = arith.divf %13, %11 : vector<8x1xf32>
    %cst_9 = arith.constant 2.000000e+00 : f32
    %24 = vector.broadcast %cst_9 : f32 to vector<8x1xf32>
    %25 = arith.mulf %24, %22 : vector<8x1xf32>
    %26 = arith.mulf %25, %23 : vector<8x1xf32>
    %27 = arith.addf %22, %23 : vector<8x1xf32>
    %28 = arith.divf %26, %27 : vector<8x1xf32>
    %cst_10 = arith.constant 0.000000e+00 : f32
    %29 = vector.broadcast %cst_10 : f32 to vector<1x120xf32>
    %cst_11 = arith.constant dense<0.000000e+00> : vector<1xf32>
    %30 = vector.multi_reduction <add>, %21, %cst_11 [0] : vector<8x1xf32> to vector<1xf32>
    %31 = vector.shape_cast %30 : vector<1xf32> to vector<1x1xf32>
    %cst_12 = arith.constant dense<0.000000e+00> : vector<1xf32>
    %32 = vector.multi_reduction <add>, %22, %cst_12 [0] : vector<8x1xf32> to vector<1xf32>
    %33 = vector.shape_cast %32 : vector<1xf32> to vector<1x1xf32>
    %cst_13 = arith.constant dense<0.000000e+00> : vector<1xf32>
    %34 = vector.multi_reduction <add>, %23, %cst_13 [0] : vector<8x1xf32> to vector<1xf32>
    %35 = vector.shape_cast %34 : vector<1xf32> to vector<1x1xf32>
    %cst_14 = arith.constant dense<0.000000e+00> : vector<1xf32>
    %36 = vector.multi_reduction <add>, %28, %cst_14 [0] : vector<8x1xf32> to vector<1xf32>
    %37 = vector.shape_cast %36 : vector<1xf32> to vector<1x1xf32>
    %cst_15 = arith.constant dense<0.000000e+00> : vector<1xf32>
    %38 = vector.multi_reduction <add>, %19, %cst_15 [0] : vector<8x1xf32> to vector<1xf32>
    %39 = vector.shape_cast %38 : vector<1xf32> to vector<1x1xf32>
    %cst_16 = arith.constant dense<0.000000e+00> : vector<1xf32>
    %40 = vector.multi_reduction <add>, %9, %cst_16 [0] : vector<8x1xf32> to vector<1xf32>
    %41 = vector.shape_cast %40 : vector<1xf32> to vector<1x1xf32>
    %cst_17 = arith.constant dense<0.000000e+00> : vector<1xf32>
    %42 = vector.multi_reduction <add>, %11, %cst_17 [0] : vector<8x1xf32> to vector<1xf32>
    %43 = vector.shape_cast %42 : vector<1xf32> to vector<1x1xf32>
    %cst_18 = arith.constant dense<0.000000e+00> : vector<1xf32>
    %44 = vector.multi_reduction <add>, %13, %cst_18 [0] : vector<8x1xf32> to vector<1xf32>
    %45 = vector.shape_cast %44 : vector<1xf32> to vector<1x1xf32>
    %46 = tpu.concatenate %31, %33, %35, %37, %39, %41, %43, %45, %29 in 1 : vector<1x1xf32>, vector<1x1xf32>, vector<1x1xf32>, vector<1x1xf32>, vector<1x1xf32>, vector<1x1xf32>, vector<1x1xf32>, vector<1x1xf32>, vector<1x120xf32> -> vector<1x128xf32>
    %c0_19 = arith.constant 0 : index
    %c0_20 = arith.constant 0 : index
    %c0_21 = arith.constant 0 : index
    %47 = vector.load %arg4[%c0_19, %c0_20, %c0_21] : memref<1x1x128xf32, #tpu.memory_space<vmem>>, vector<1x1x128xf32>
    %48 = vector.shape_cast %47 : vector<1x1x128xf32> to vector<1x128xf32>
    %49 = vector.shape_cast %46 : vector<1x128xf32> to vector<1x1x128xf32>
    tpu.vector_store %arg4[%c0_19, %c0_20, %c0_21], %49 {strides = array<i32>} : memref<1x1x128xf32, #tpu.memory_space<vmem>>, vector<1x1x128xf32>,
    return
  }
  func.func @transform_0(%arg0: i32) -> i32 {
    %c0_i32 = arith.constant 0 : i32
    %c0_i32_0 = arith.constant 0 : i32
    return %c0_i32 : i32
  }
  func.func @transform_1(%arg0: i32) -> (i32, i32) {
    %c0_i32 = arith.constant 0 : i32
    %c0_i32_0 = arith.constant 0 : i32
    return %arg0, %c0_i32 : i32, i32
  }
  func.func @transform_2(%arg0: i32) -> (i32, i32) {
    %c0_i32 = arith.constant 0 : i32
    %c0_i32_0 = arith.constant 0 : i32
    return %arg0, %c0_i32 : i32, i32
  }
  func.func @transform_3(%arg0: i32) -> (i32, i32, i32) {
    %c0_i32 = arith.constant 0 : i32
    %c0_i32_0 = arith.constant 0 : i32
    %c0_i32_1 = arith.constant 0 : i32
    return %arg0, %c0_i32, %c0_i32_0 : i32, i32, i32
  }
}

</mosaic_0001>

<bundles_post_ra>
// kernel: _thresholded_metrics.1
= control target key start
LH: loop header
LB: loop body
LE: loop exit
PB: predicated region body
PF: predicated region fallthrough
CT: control target
= control target key end

     0   :  { %9 = vsyncpa [#allocation4], 0  ;;  %s162_s12 = smov [#allocation3]   ;;  %s205_s0 = inlined_call_operand.<no memory space> [shape: f32[1], index: 0, kind: input, shape index: {}]   ;;  %s206_s1 = inlined_call_operand.hbm [shape: f32[8,81], index: 1, kind: input, shape index: {}]   ;;  %s207_s2 = inlined_call_operand.vmem [shape: f32[8,81], index: 2, kind: input, shape index: {}]   ;;  %s208_s3 = inlined_call_operand.vmem [shape: f32[1,1,128], index: 3, kind: output, shape index: {}]  }
   0x1   :  { %s18_s13 = sshll.u32 %s162_s12, 4  ;;  %s138_s16 = scalar_lea.hbm %s206_s1, 128  ;;  %s19_s13 = int_to_ptr.vmem [resolvable:$true] %s18_s13 }
   0x2   :  { %p139_p0 = scmp.ne.s32.totalorder %s206_s1, %s138_s16  ;;  %p142_p1 = scmp.lt.u32.totalorder %s138_s16, %s206_s1 }
   0x4   :  { %p144_p2 = pnand %p142_p1, %p139_p0 }
   0x6   :  { %147 = shalt.err (!%p144_p2)
}
   0x7   :  { %s148_s21 = scalar_lea.vmem %s19_s13, 128  ;;  %p153_p4 = scmp.lt.s32.totalorder %s19_s13, %s19_s13 }
   0x8   :  { %p149_p3 = scmp.ne.s32.totalorder %s19_s13, %s148_s21  ;;  %p154_p5 = scmp.lt.s32.totalorder %s148_s21, %s148_s21 }
   0xa   :  { %p155_p6 = por %p154_p5, %p153_p4 }
   0xc   :  { %p156_p7 = pnand %p155_p6, %p149_p3 }
   0xe   :  { %159 = shalt.err (!%p156_p7)
}
   0xf   :  { %21 = dma.hbm_to_vmem [thread:$0]  %s206_s1, 128, %s19_s13, [#allocation4]  }
  0x10   :  { %160 = dma.done.wait [#allocation4], 128  }
  0x11   :  { %161 = vsyncadd [#allocation4], 4294967168  ;;  %v29_v0 = vstv %s205_s0  ;;  %v27_v1 = vld [vmem:[#allocation3] sm:$0xff]  ;;  %vm35_vm0 = vcmask 662528   ;;  %v163_v3 = vmov 0.0   ;;  %vm107_vm2 = vcmask 7168  }
  0x12   :  { %v33_v2 = vld [vmem:[%s207_s2] sm:$0xff]  ;;  %vm30_vm1 = vcmp.ge.f32.partialorder %v27_v1, %v29_v0  ;;  %vm109_vm3 = vcmask 15360   ;;  %vm111_vm4 = vcmask 23552   ;;  %vm113_vm5 = vcmask 31744  }
  0x13   :  { %v129_v4 = vsel %vm30_vm1, 1.0, %v163_v3  ;;  %v39_v7 = vsel %vm35_vm0, %v33_v2, 0.0  ;;  %vm115_vm6 = vcmask 39936   ;;  %vm117_vm7 = vcmask 48128  }
  0x14   :  { %v36_v5 = vsel %vm35_vm0, %v129_v4, 0.0  ;;  %v34_v6 = vmul.f32 %v129_v4, %v33_v2  ;;  %vm119_vm8 = vcmask 56320   ;;  %vm121_vm9 = vcmask 64512  }
  0x15   :  { %37 = vadd.xlane.f32.xlu0 %v36_v5 }
  0x16   :  { %v42_v8 = vsel %vm35_vm0, %v34_v6, 0.0 }
  0x17   :  { %43 = vadd.xlane.f32.xlu1 %v42_v8 }
  0x19   :  { %40 = vadd.xlane.f32.xlu0 %v39_v7 }
  0xa2   :  { %v38_v9 = vpop.xlane.xlu0 %37 }
  0xa3   :  { %132 = vrcp.f32 %v38_v9  ;;  %v45_v12 = vsub.f32 81.0, %v38_v9  ;;  %v89_v28 = vrot.slane %v38_v9, 4 }
  0xa4   :  { %v44_v11 = vpop.xlane.xlu1 %43 }
  0xa5   :  { %v47_v14 = vmul.f32 2.0, %v44_v11  ;;  %v101_v33 = vrot.slane %v44_v11, 4  ;;  %v90_v36 = vadd.f32 %v89_v28, %v38_v9 }
  0xa6   :  { %v41_v10 = vpop.xlane.xlu0 %40 }
  0xa7   :  { %134 = vrcp.f32 %v41_v10  ;;  %v46_v13 = vsub.f32 %v45_v12, %v41_v10  ;;  %v95_v30 = vrot.slane %v41_v10, 4  ;;  %v102_v43 = vadd.f32 %v101_v33, %v44_v11 }
  0xa8   :  { %v91_v46 = vrot.slane %v90_v36, 2 }
  0xa9   :  { %v48_v16 = vadd.f32 %v47_v14, %v46_v13  ;;  %v96_v40 = vadd.f32 %v95_v30, %v41_v10  ;;  %v103_v52 = vrot.slane %v102_v43, 2 }
  0xaa   :  { %v92_v55 = vadd.f32 %v91_v46, %v90_v36 }
  0xab   :  { %v49_v20 = vmul.f32 0.012345679, %v48_v16  ;;  %v83_v27 = vrot.slane %v48_v16, 4  ;;  %v97_v49 = vrot.slane %v96_v40, 2  ;;  %v104_v61 = vadd.f32 %v103_v52, %v102_v43 }
  0xac   :  { %v93_v0 = vrot.slane %v92_v55, 1 }
  0xad   :  { %v133_v15 = vpop.eup %132  ;;  %v59_v24 = vrot.slane %v49_v20, 4  ;;  %v84_v35 = vadd.f32 %v83_v27, %v48_v16  ;;  %v98_v58 = vadd.f32 %v97_v49, %v96_v40  ;;  %v105_v5 = vrot.slane %v104_v61, 1 }
  0xae   :  { %v51_v18 = vmul.f32 %v133_v15, %v44_v11  ;;  %v94_v9 = vadd.f32 %v93_v0, %v92_v55 }
  0xaf   :  { %v60_v29 = vadd.f32 %v59_v24, %v49_v20  ;;  %v85_v45 = vrot.slane %v84_v35, 2  ;;  %v99_v3 = vrot.slane %v98_v58, 1  ;;  %v106_v13 = vadd.f32 %v105_v5, %v104_v61 }
  0xb0   :  { %v65_v22 = vrot.slane %v51_v18, 4  ;;  %v54_v31 = vmul.f32 2.0, %v51_v18 }
  0xb1   :  { %v135_v17 = vpop.eup %134  ;;  %v61_v38 = vrot.slane %v60_v29, 2  ;;  %v86_v54 = vadd.f32 %v85_v45, %v84_v35 }
  0xb2   :  { %v53_v19 = vmul.f32 %v135_v17, %v44_v11  ;;  %v66_v25 = vadd.f32 %v65_v22, %v51_v18  ;;  %v100_v11 = vadd.f32 %v99_v3, %v98_v58 }
  0xb3   :  { %v62_v47 = vadd.f32 %v61_v38, %v60_v29  ;;  %v87_v63 = vrot.slane %v86_v54, 1 }
  0xb4   :  { %v56_v21 = vadd.f32 %v53_v19, %v51_v18  ;;  %v71_v23 = vrot.slane %v53_v19, 4  ;;  %v67_v32 = vrot.slane %v66_v25, 2  ;;  %v55_v37 = vmul.f32 %v54_v31, %v53_v19 }
  0xb5   :  { %v63_v56 = vrot.slane %v62_v47, 1  ;;  %v88_v7 = vadd.f32 %v87_v63, %v86_v54 }
  0xb6   :  { %136 = vrcp.f32 %v56_v21  ;;  %v72_v26 = vadd.f32 %v71_v23, %v53_v19  ;;  %v68_v42 = vadd.f32 %v67_v32, %v66_v25 }
  0xb7   :  { %v64_v1 = vadd.f32 %v63_v56, %v62_v47 }
  0xb8   :  { %v73_v34 = vrot.slane %v72_v26, 2  ;;  %v69_v50 = vrot.slane %v68_v42, 1 }
  0xba   :  { %v74_v44 = vadd.f32 %v73_v34, %v72_v26  ;;  %v70_v59 = vadd.f32 %v69_v50, %v68_v42 }
  0xbc   :  { %v75_v53 = vrot.slane %v74_v44, 1  ;;  %v108_v6 = vsel %vm107_vm2, %v64_v1, %v70_v59 }
  0xbe   :  { %v76_v62 = vadd.f32 %v75_v53, %v74_v44 }
  0xc0   :  { %v137_v39 = vpop.eup %136  ;;  %v110_v8 = vsel %vm109_vm3, %v108_v6, %v76_v62 }
  0xc1   :  { %v58_v41 = vmul.f32 %v137_v39, %v55_v37 }
  0xc3   :  { %v77_v48 = vrot.slane %v58_v41, 4 }
  0xc5   :  { %v78_v51 = vadd.f32 %v77_v48, %v58_v41 }
  0xc7   :  { %v79_v57 = vrot.slane %v78_v51, 2 }
  0xc9   :  { %v80_v60 = vadd.f32 %v79_v57, %v78_v51 }
  0xcb   :  { %v81_v2 = vrot.slane %v80_v60, 1 }
  0xcd   :  { %v82_v4 = vadd.f32 %v81_v2, %v80_v60 }
  0xcf   :  { %v112_v10 = vsel %vm111_vm4, %v110_v8, %v82_v4 }
  0xd0   :  { %v114_v12 = vsel %vm113_vm5, %v112_v10, %v88_v7 }
  0xd1   :  { %v116_v14 = vsel %vm115_vm6, %v114_v12, %v94_v9 }
  0xd2   :  { %v118_v15 = vsel %vm117_vm7, %v116_v14, %v100_v11 }
  0xd3   :  { %v120_v16 = vsel %vm119_vm8, %v118_v15, %v106_v13 }
  0xd4   :  { %v122_v17 = vsel %vm121_vm9, %v120_v16, 0.0 }
  0xd5   :  { %123 = vst [vmem:[%s208_s3] sm:$0x1] %v122_v17 }
  0xd6   :  { %128 = vsyncpa [#allocation4], 1 }

</bundles_post_ra>
